<compile_context>
chip_gen: v7x
topology: tpu7x:2x2x1
jax: 0.10.0
libtpu: 0.0.40
codegen_flags: <defaults>
</compile_context>

<pallas_src>
import functools

import jax
import jax.numpy as jnp
from jax.experimental import pallas as pl
from jax.experimental.pallas import tpu as pltpu


# VMEM budgets (bytes).
_VMEM_LIMIT = 48 << 20          # scoped limit requested from Mosaic
_FUSED_BUDGET = 40 << 20        # max in-flight bytes allowed for the fused path
_FALLBACK_TILE_BYTES = 4 << 20  # per-block byte budget for the two-pass path


def _pick_hw_tile(hw, c, itemsize, max_block_bytes=_FALLBACK_TILE_BYTES):
    """Lane-aligned HW tile (multiple of 128) or the whole extent, within budget."""
    max_lanes = max(128, max_block_bytes // max(1, c * itemsize))
    if hw <= max_lanes:
        return hw                       # whole-extent block (always legal)
    return max(128, (max_lanes // 128) * 128)


# ---------------------------------------------------------------------------
# Fused single-pass kernel: pool -> 1x1 conv -> sigmoid -> multiply, grid=(B,)
# ---------------------------------------------------------------------------
def _ese_fused_kernel(x_ref, wt_ref, bias_ref, o_ref, *, inv_hw):
    # x_ref: (1, C, HW) one full batch slab (native dtype), resident in VMEM.
    # wt_ref: (C, C) weight in (in_ch, out_ch) layout (f32); bias_ref: (1, C).
    x = x_ref[...]
    pooled = jnp.sum(x, axis=-1, dtype=jnp.float32) * inv_hw          # (1, C)
    z = jnp.dot(pooled, wt_ref[...],
                preferred_element_type=jnp.float32) + bias_ref[...]   # (1, C)
    gate = jax.nn.sigmoid(z).astype(x.dtype)                          # (1, C)
    o_ref[...] = x * gate[:, :, None]                                 # lane splat


# ---------------------------------------------------------------------------
# Fallback pass 1: HW-tiled global average pool -> pooled means (B, 1, C) f32
# ---------------------------------------------------------------------------
def _pool_kernel(x_ref, pooled_ref, acc_ref, *, hw, thw, inv_hw, needs_mask):
    h = pl.program_id(1)

    @pl.when(h == 0)
    def _():
        acc_ref[...] = jnp.zeros_like(acc_ref)

    xb = x_ref[...]                                                   # (1, C, thw)
    if needs_mask:
        # Last tile may run past HW; zero the out-of-bounds lanes before summing.
        lane = jax.lax.broadcasted_iota(jnp.int32, xb.shape, dimension=2)
        valid = (h * thw + lane) < hw
        xb = jnp.where(valid, xb, jnp.zeros_like(xb))
    acc_ref[...] += jnp.sum(xb, axis=-1, dtype=jnp.float32)           # (1, C)

    @pl.when(h == pl.num_programs(1) - 1)
    def _():
        pooled_ref[...] = (acc_ref[...] * inv_hw)[:, None, :]


# ---------------------------------------------------------------------------
# Fallback pass 2: streaming rescale  out = x * gate (gate splat across lanes)
# ---------------------------------------------------------------------------
def _scale_kernel(x_ref, gate_ref, o_ref):
    # x_ref: (1, C, thw), gate_ref: (1, C, 1) -> broadcast along the lane axis.
    o_ref[...] = x_ref[...] * gate_ref[...]


def ese_forward(x_nchw, conv_w, conv_b, *, force_two_pass=False, hw_tile=None):
    """x_nchw: (B, C, H, W); conv_w: (C, C, 1, 1); conv_b: (C,)."""
    B, C, H, W = x_nchw.shape
    HW = H * W
    itemsize = jnp.dtype(x_nchw.dtype).itemsize

    # Free reshape (no data movement): channels on sublanes, HW on lanes.
    x = x_nchw.reshape(B, C, HW)
    wt = conv_w[:, :, 0, 0].T.astype(jnp.float32)      # (C_in, C_out), tiny
    bias = conv_b.reshape(1, C).astype(jnp.float32)    # (1, C)

    def compiler(sem):
        return pltpu.CompilerParams(dimension_semantics=sem,
                                    vmem_limit_bytes=_VMEM_LIMIT)

    slab_bytes = C * HW * itemsize
    wt_bytes = C * C * 4
    # in + out slabs double-buffered, weight/bias double-buffered, headroom.
    fused_vmem = 4 * slab_bytes + 2 * wt_bytes + 2 * C * 4 + (1 << 20)
    use_fused = (not force_two_pass) and (fused_vmem <= _FUSED_BUDGET)

    # ---- fused single-pass path ---------------------------------------------
    if use_fused:
        out = pl.pallas_call(
            functools.partial(_ese_fused_kernel, inv_hw=1.0 / HW),
            out_shape=jax.ShapeDtypeStruct((B, C, HW), x.dtype),
            grid_spec=pltpu.PrefetchScalarGridSpec(
                num_scalar_prefetch=0,
                grid=(B,),
                in_specs=[
                    pl.BlockSpec((1, C, HW), lambda b: (b, 0, 0)),
                    pl.BlockSpec((C, C), lambda b: (0, 0)),
                    pl.BlockSpec((1, C), lambda b: (0, 0)),
                ],
                out_specs=pl.BlockSpec((1, C, HW), lambda b: (b, 0, 0)),
            ),
            compiler_params=compiler(("parallel",)),
            cost_estimate=pl.CostEstimate(
                flops=2 * B * C * HW + 2 * B * C * C,
                transcendentals=B * C,
                bytes_accessed=2 * B * C * HW * itemsize + wt_bytes + C * 4,
            ),
        )(x, wt, bias)
        return out.reshape(B, C, H, W)

    # ---- two-pass fallback ---------------------------------------------------
    thw = hw_tile if hw_tile is not None else _pick_hw_tile(HW, C, itemsize)
    n_hw = pl.cdiv(HW, thw)
    needs_mask = (HW % thw) != 0

    pooled = pl.pallas_call(
        functools.partial(_pool_kernel, hw=HW, thw=thw, inv_hw=1.0 / HW,
                          needs_mask=needs_mask),
        out_shape=jax.ShapeDtypeStruct((B, 1, C), jnp.float32),
        grid_spec=pltpu.PrefetchScalarGridSpec(
            num_scalar_prefetch=0,
            grid=(B, n_hw),
            in_specs=[pl.BlockSpec((1, C, thw), lambda bi, hi: (bi, 0, hi))],
            out_specs=pl.BlockSpec((1, 1, C), lambda bi, hi: (bi, 0, 0)),
            scratch_shapes=[pltpu.VMEM((1, C), jnp.float32)],
        ),
        compiler_params=compiler(("parallel", "arbitrary")),
        cost_estimate=pl.CostEstimate(
            flops=B * C * HW,
            transcendentals=0,
            bytes_accessed=B * C * HW * itemsize + B * C * 4,
        ),
    )(x)

    # Tiny (B, C) @ (C, C) conv + sigmoid in plain JAX: keeps the (possibly
    # multi-MiB) weight out of kernel VMEM and off the per-batch critical path.
    gate = jax.nn.sigmoid(pooled.reshape(B, C) @ wt + bias).astype(x.dtype)
    gate_col = gate.reshape(B, C, 1)

    out = pl.pallas_call(
        _scale_kernel,
        out_shape=jax.ShapeDtypeStruct((B, C, HW), x.dtype),
        grid_spec=pltpu.PrefetchScalarGridSpec(
            num_scalar_prefetch=0,
            grid=(B, n_hw),
            in_specs=[
                pl.BlockSpec((1, C, thw), lambda bi, hi: (bi, 0, hi)),
                pl.BlockSpec((1, C, 1), lambda bi, hi: (bi, 0, 0)),
            ],
            out_specs=pl.BlockSpec((1, C, thw), lambda bi, hi: (bi, 0, hi)),
        ),
        compiler_params=compiler(("parallel", "parallel")),
        cost_estimate=pl.CostEstimate(
            flops=B * C * HW,
            transcendentals=0,
            bytes_accessed=2 * B * C * HW * itemsize + B * C * itemsize,
        ),
    )(x, gate_col)

    return out.reshape(B, C, H, W)


def ese_reference(x_nchw, conv_w, conv_b):
    """Pure-JAX reference mirroring the PyTorch forward."""
    pooled = jnp.mean(x_nchw, axis=(2, 3))                       # (B, C)
    z = pooled @ conv_w[:, :, 0, 0].T + conv_b                   # (B, C)
    gate = jax.nn.sigmoid(z)[:, :, None, None]                   # (B, C, 1, 1)
    return gate * x_nchw


if __name__ == "__main__":
    key = jax.random.PRNGKey(0)
    kx, kw, kb = jax.random.split(key, 3)

    B, C, H, W = 2, 4, 16, 16
    x = jax.random.normal(kx, (B, C, H, W), dtype=jnp.float32)
    conv_w = jax.random.normal(kw, (C, C, 1, 1), dtype=jnp.float32) * 0.1
    conv_b = jax.random.normal(kb, (C,), dtype=jnp.float32) * 0.1

    ref = ese_reference(x, conv_w, conv_b)

    # 1) Fused single-pass path (the one taken for all realistic VoVNet shapes).
    out = jax.block_until_ready(ese_forward(x, conv_w, conv_b))
    assert out.shape == (B, C, H, W)
    assert jnp.allclose(out, ref, atol=1e-5, rtol=1e-5)

    # 2) Two-pass fallback, exact HW tiling (HW = 256, tile = 128).
    out2 = jax.block_until_ready(
        ese_forward(x, conv_w, conv_b, force_two_pass=True, hw_tile=128))
    assert jnp.allclose(out2, ref, atol=1e-5, rtol=1e-5)

    # 3) Two-pass fallback with a partial (lane-masked) last tile: HW = 144.
    x3 = jax.random.normal(kx, (2, 4, 12, 12), dtype=jnp.float32)
    ref3 = ese_reference(x3, conv_w, conv_b)
    out3 = jax.block_until_ready(
        ese_forward(x3, conv_w, conv_b, force_two_pass=True, hw_tile=128))
    assert jnp.allclose(out3, ref3, atol=1e-5, rtol=1e-5)

    print("KERNEL_OK")
</pallas_src>

<mosaic_0001>
module attributes {stable_mosaic.version = 11 : i64} {
  func.func @_ese_fused_kernel(%arg0: i32, %arg1: memref<1x4x256xf32, #tpu.memory_space<vmem>>, %arg2: memref<4x4xf32, #tpu.memory_space<vmem>>, %arg3: memref<1x4xf32, #tpu.memory_space<vmem>>, %arg4: memref<1x4x256xf32, #tpu.memory_space<vmem>>) attributes {dimension_semantics = [#tpu.dimension_semantics<parallel>], iteration_bounds = array<i64: 2>, scalar_prefetch = 0 : i64, scratch_operands = 0 : i64, tpu.core_type = #tpu.core_type<tc>, window_params = [{transform_indices = @transform_0, window_bounds = array<i64: 1, 4, 256>}, {pipeline_mode = #tpu.pipeline_mode<synchronous>, transform_indices = @transform_1, window_bounds = array<i64: 4, 4>}, {pipeline_mode = #tpu.pipeline_mode<synchronous>, transform_indices = @transform_2, window_bounds = array<i64: 1, 4>}, {transform_indices = @transform_3, window_bounds = array<i64: 1, 4, 256>}]} {
    %c0 = arith.constant 0 : index
    %c0_0 = arith.constant 0 : index
    %c0_1 = arith.constant 0 : index
    %0 = vector.load %arg1[%c0, %c0_0, %c0_1] : memref<1x4x256xf32, #tpu.memory_space<vmem>>, vector<1x4x256xf32>
    %cst = arith.constant dense<0.000000e+00> : vector<1x4xf32>
    %1 = vector.multi_reduction <add>, %0, %cst [2] : vector<1x4x256xf32> to vector<1x4xf32>
    %cst_2 = arith.constant 3.906250e-03 : f32
    %2 = vector.broadcast %cst_2 : f32 to vector<1x4xf32>
    %3 = arith.mulf %1, %2 : vector<1x4xf32>
    %c0_3 = arith.constant 0 : index
    %c0_4 = arith.constant 0 : index
    %4 = vector.load %arg2[%c0_3, %c0_4] : memref<4x4xf32, #tpu.memory_space<vmem>>, vector<4x4xf32>
    %cst_5 = arith.constant dense<0.000000e+00> : vector<1x4xf32>
    %5 = tpu.matmul %3, %4, %cst_5 {dimension_numbers = #tpu.dot_dimension_numbers<[1], [0], [0], [1], [0, 0, 1, 1], [], []>} : vector<1x4xf32>, vector<4x4xf32>, vector<1x4xf32> -> vector<1x4xf32>
    %c0_6 = arith.constant 0 : index
    %c0_7 = arith.constant 0 : index
    %6 = vector.load %arg3[%c0_6, %c0_7] : memref<1x4xf32, #tpu.memory_space<vmem>>, vector<1x4xf32>
    %7 = arith.addf %5, %6 : vector<1x4xf32>
    %8 = arith.negf %7 : vector<1x4xf32>
    %9 = math.exp %8 : vector<1x4xf32>
    %cst_8 = arith.constant 1.000000e+00 : f32
    %10 = vector.broadcast %cst_8 : f32 to vector<1x4xf32>
    %11 = arith.addf %10, %9 : vector<1x4xf32>
    %12 = arith.divf %10, %11 : vector<1x4xf32>
    %13 = vector.shape_cast %12 : vector<1x4xf32> to vector<1x4x1xf32>
    %14 = vector.broadcast %13 : vector<1x4x1xf32> to vector<1x4x256xf32>
    %15 = arith.mulf %0, %14 : vector<1x4x256xf32>
    %c0_9 = arith.constant 0 : index
    %c0_10 = arith.constant 0 : index
    %c0_11 = arith.constant 0 : index
    %16 = vector.load %arg4[%c0_9, %c0_10, %c0_11] : memref<1x4x256xf32, #tpu.memory_space<vmem>>, vector<1x4x256xf32>
    tpu.vector_store %arg4[%c0_9, %c0_10, %c0_11], %15 {strides = array<i32>} : memref<1x4x256xf32, #tpu.memory_space<vmem>>, vector<1x4x256xf32>,
    return
  }
  func.func @transform_0(%arg0: i32) -> (i32, i32, i32) {
    %c0_i32 = arith.constant 0 : i32
    %c0_i32_0 = arith.constant 0 : i32
    %c0_i32_1 = arith.constant 0 : i32
    return %arg0, %c0_i32, %c0_i32_0 : i32, i32, i32
  }
  func.func @transform_1(%arg0: i32) -> (i32, i32) {
    %c0_i32 = arith.constant 0 : i32
    %c0_i32_0 = arith.constant 0 : i32
    %c0_i32_1 = arith.constant 0 : i32
    return %c0_i32, %c0_i32_0 : i32, i32
  }
  func.func @transform_2(%arg0: i32) -> (i32, i32) {
    %c0_i32 = arith.constant 0 : i32
    %c0_i32_0 = arith.constant 0 : i32
    %c0_i32_1 = arith.constant 0 : i32
    return %c0_i32, %c0_i32_0 : i32, i32
  }
  func.func @transform_3(%arg0: i32) -> (i32, i32, i32) {
    %c0_i32 = arith.constant 0 : i32
    %c0_i32_0 = arith.constant 0 : i32
    %c0_i32_1 = arith.constant 0 : i32
    return %arg0, %c0_i32, %c0_i32_0 : i32, i32, i32
  }
}

</mosaic_0001>

<bundles_post_ra>
// kernel: tpu_custom_call.1
= control target key start
LH: loop header
LB: loop body
LE: loop exit
PB: predicated region body
PF: predicated region fallthrough
CT: control target
= control target key end

     0   :  { %8 = vsyncpa [#allocation3], 0  ;;  %s872_s0 = inlined_call_operand.hbm [shape: f32[2,4,256], index: 0, kind: input, shape index: {}]   ;;  %s873_s1 = inlined_call_operand.hbm [shape: f32[4,4], index: 1, kind: input, shape index: {}]   ;;  %s874_s2 = inlined_call_operand.vmem [shape: f32[1,4], index: 2, kind: input, shape index: {}]   ;;  %s875_s3 = inlined_call_operand.hbm [shape: f32[2,4,256], index: 3, kind: output, shape index: {}]  }
   0x1   :  { %10 = vsyncpa [#allocation3 + $0x1], 0 }
   0x2   :  { %11 = vsyncpa [#allocation6], 0 }
   0x3   :  { %12 = vsyncpa [#allocation4], 0 }
   0x4   :  { %14 = vsyncpa [#allocation4 + $0x1], 0  ;;  %s664_s12 = smov 0   ;;  %s666_s13 = smov 0  }
   0x5   :  { %s668_s14 = smov 0   ;;  %s670_s15 = smov 0  }
   0x6 LB: > { %s685_s16 = sadd.s32 4294967295, %s636_s15   ;;  %s415_s17 = sadd.s32 4294967294, %s636_s15   ;;  %s636_s15 = sphi %s670_s15, %s899_s15   ;;  %s632_s14 = sphi %s668_s14, %s898_s14   ;;  %s628_s13 = sphi %s666_s13, %s897_s13   ;;  %s624_s12 = sphi %s664_s12, %s896_s12  }
   0x7   : > { %p40_p0 = scmp.ne.s32.totalorder %s628_s13, %s624_s12  ;;  %p876_p1 = scmp.eq.s32.totalorder %s685_s16, 0 }
   0x8   : > { %p112_p3 = scmp.eq.s32.totalorder %s415_s17, 1  ;;  %p416_p5 = scmp.ge.s32.totalorder %s636_s15, 1 }
   0x9   : > { %p694_p4 = por %p876_p1, %p40_p0  ;;  %p119_p7 = scmp.lt.s32.totalorder %s636_s15, 3 }
   0xa   : > { %p699_p6 = por %p112_p3, %p40_p0  ;;  %s638_s21 = smov [#allocation5]  }
   0xb   : > { %s879_s18 = scalar_select %p694_p4, 1, 0 }
   0xc   : > { %s880_s19 = scalar_select %p699_p6, 1, 0 }
   0xd   : > { %p704_p8 = pnand %p416_p5, %p119_p7  ;;  %s132_s22 = sshll.u32 %s638_s21, 4  ;;  %s133_s22 = int_to_ptr.vmem [resolvable:$true] %s132_s22 }
   0xe   : > { %s712_s23 = sadd.s32 1, %s636_s15   ;;  %s27_s27 = sadd.s32 1, %s632_s14 }
   0xf   : > { %s881_s20 = scalar_select %p704_p8, 1, 0 }
  0x10   : > { %p451_p10 = pneg %p704_p8  ;;  %s24_s25 = ssub.s32 %s636_s15, %s712_s23 }
  0x11   : > { %p722_p12 = scmp.eq.s32.totalorder %s24_s25, 0  ;;  %s508_s30 = scalar_lea.hbm %s873_s1, 64 }
  0x12   : > { %p716_p11 = pnand %p451_p10, %p876_p1  ;;  %p509_p0 = scmp.ne.s32.totalorder %s873_s1, %s508_s30 }
  0x13   : > { %s883_s26 = scalar_select %p722_p12, 1, 0 }
  0x14   : > { %p510_p3 = pneg %p716_p11  ;;  %p515_p10 = scmp.lt.u32.totalorder %s508_s30, %s873_s1 }
  0x16   : > { %p511_p5 = pnand %p510_p3, %p509_p0 }
  0x18   : > { %p512_p7 = pneg %p511_p5 }
  0x1a   : > { %p517_p9 = pnand %p515_p10, %p512_p7 }
  0x1c   : > { %520 = shalt.err (!%p517_p9)
}
  0x1d   : > { %s521_s8 = scalar_lea.vmem %s133_s22, 64  ;;  %p529_p6 = scmp.lt.s32.totalorder %s133_s22, %s133_s22 }
  0x1e   : > { %p522_p1 = scmp.ne.s32.totalorder %s133_s22, %s521_s8  ;;  %p530_p4 = scmp.lt.s32.totalorder %s521_s8, %s521_s8 }
  0x20   : > { %p524_p2 = pnand %p522_p1, %p510_p3  ;;  %p531_p8 = por %p530_p4, %p529_p6 }
  0x22   : > { %p525_p13 = pneg %p524_p2 }
  0x24   : > { %p532_p12 = pnand %p531_p8, %p525_p13 }
  0x26   : > { %535 = shalt.err (!%p532_p12)
}
  0x27   : > { %454 = dma.hbm_to_vmem [thread:$0]  (!%p716_p11), %s873_s1, 64, %s133_s22, [#allocation6]  }
  0x28   : > { %p884_p1 = scmp.ne.s32.totalorder %s883_s26, 0  ;;  %p35_p2 = scmp.eq.s32.totalorder %s636_s15, 0 }
  0x29   : > { %p885_p4 = scmp.ne.s32.totalorder %s632_s14, %s628_s13  ;;  %p886_p6 = scmp.eq.s32.totalorder %s685_s16, 1 }
  0x2a   : > { %s748_s11 = scalar_select %p884_p1, %s632_s14, %s27_s27  }
  0x2b   : > { %p756_p8 = por %p886_p6, %p885_p4  ;;  %p464_p9 = scmp.lt.s32.totalorder %s636_s15, 2 }
  0x2c   : > { %s146_s21 = sand.u32 1, %s632_s14   ;;  %p888_p12 = pmov %p885_p4 }
  0x2d   : > { %s419_s24 = sshll.u32 %s146_s21, 3  ;;  %s434_s25 = sshll.u32 %s636_s15, 7 }
  0x2e   : > { %p36_p13 = por %p35_p2, %p888_p12  ;;  %s769_s22 = scalar_lea.hbm %s872_s0, %s434_s25 }
  0x2f   : > { %s150_s26 = scalar_lea.vmem [#allocation2], %s419_s24  ;;  %s147_s4 = scalar_lea.sflag [#allocation3], %s146_s21 }
  0x30   : > { %s158_s27 = sshll.u32 %s150_s26, 4  ;;  %p771_p11 = pnand %p464_p9, %p36_p13  ;;  %s775_s27 = int_to_ptr.vmem [resolvable:$true] %s158_s27 }
  0x31   : > { %s536_s5 = scalar_lea.hbm %s769_s22, 128  ;;  %s541_s8 = scalar_lea.hbm %s872_s0, 256 }
  0x32   : > { %p537_p0 = scmp.ne.s32.totalorder %s769_s22, %s536_s5  ;;  %p538_p3 = pneg %p771_p11 }
  0x33   : > { %p542_p10 = scmp.lt.u32.totalorder %s769_s22, %s872_s0  ;;  %p543_p1 = scmp.lt.u32.totalorder %s541_s8, %s536_s5 }
  0x34   : > { %p539_p5 = pnand %p538_p3, %p537_p0  ;;  %p545_p4 = scmp.lt.u32.totalorder %s536_s5, %s769_s22 }
  0x35   : > { %p544_p2 = por %p543_p1, %p542_p10 }
  0x36   : > { %p540_p7 = pneg %p539_p5 }
  0x37   : > { %p546_p6 = por %p545_p4, %p544_p2 }
  0x39   : > { %p547_p9 = pnand %p546_p6, %p540_p7 }
  0x3b   : > { %550 = shalt.err (!%p547_p9)
}
  0x3c   : > { %s551_s21 = scalar_lea.vmem %s775_s27, 128  ;;  %s639_s24 = smov [#allocation2]  }
  0x3d   : > { %p552_p12 = scmp.ne.s32.totalorder %s775_s27, %s551_s21  ;;  %s556_s25 = sshll.u32 %s639_s24, 4  ;;  %s557_s25 = int_to_ptr.vmem [resolvable:$false] %s556_s25 }
  0x3e   : > { %s558_s28 = scalar_lea.vmem %s557_s25, 256  ;;  %p559_p5 = scmp.lt.s32.totalorder %s775_s27, %s557_s25 }
  0x3f   : > { %p554_p13 = pnand %p552_p12, %p538_p3  ;;  %p560_p10 = scmp.lt.s32.totalorder %s558_s28, %s551_s21 }
  0x41   : > { %p555_p0 = pneg %p554_p13  ;;  %p561_p1 = por %p560_p10, %p559_p5 }
  0x43   : > { %p562_p2 = pnand %p561_p1, %p555_p0 }
  0x45   : > { %565 = shalt.err (!%p562_p2)
}
  0x46   : > { %458 = dma.hbm_to_vmem [thread:$0]  (!%p771_p11), %s769_s22, 128, %s775_s27, %s147_s4  }
  0x47   : > { %p890_p7 = scmp.ne.s32.totalorder %s881_s20, 0 }
  0x48   : > { %s805_s29 = sand.u32 (!%p890_p7), 1, %s628_s13   ;;  %p891_p3 = scmp.ne.s32.totalorder (!%p890_p7), %s879_s18, 0 }
  0x49   : > { %167 = sbr.rel (%p890_p7) target bundleno = 611 (0x263), region = 32  ;;  %s423_s26 = sshll.u32 (!%p890_p7), %s805_s29, 3 }
  0x4a   : > { %s170_s5 = scalar_lea.sflag (!%p890_p7), [#allocation3], %s805_s29  ;;  %s173_s6 = scalar_lea.vmem (!%p890_p7), [#allocation2], %s423_s26 }
  0x50   : > { %611 = dma.done.wait (%p891_p3), %s170_s5, 128  }
  0x51   : > { %613 = vsyncadd (%p891_p3), %s170_s5, 4294967168  ;;  %p892_p11 = scmp.eq.s32.totalorder %s685_s16, 0 }
  0x53   : > { %615 = dma.done.wait (%p892_p11), [#allocation6], 64   ;;  %p893_p4 = pmov %p892_p11 }
  0x54   : > { %vm204_vm0 = vcmask 1043456   ;;  %v200_v0 = vld [vmem:[%s173_s6] sm:$0xff]  ;;  %v640_v5 = vmov 0.0   ;;  %v211_v6 = vld [vmem:[#allocation5] sm:$0xf]  ;;  %vm641_vm1 = vmmov 0   ;;  %v214_v7 = vlaneseq }
  0x55   : > { %617 = vsyncadd (%p893_p4), [#allocation6], 4294967232  ;;  %v202_v1 = vcombine.high %v200_v0, %v200_v0  ;;  %v205_v2 = vsel %vm204_vm0, %v200_v0, 0.0  ;;  %438 = vmatprep.subr.mxu0 %v640_v5  ;;  %440 = vmatprep.mubr.msk.f32.mxu0 %vm641_vm1, %v640_v5  ;;  %vm220_vm2 = vcmask 31744   ;;  %v212_v14 = vld [vmem:[%s874_s2] sm:$0x1] }
  0x56   : > { %439 = vmatpush3.msk.msra.mxu0 %vm204_vm0, %v211_v6  ;;  %v215_v8 = vand.u32 127, %v214_v7  ;;  %v217_v9 = vshrl.u32 %v214_v7, 7  ;;  %v642_v24 = vmov 839922192   ;;  %s435_s22 = sshll.u32 %s685_s16, 7  ;;  %s199_s27 = scalar_lea.vmem [#allocation7], %s423_s26 }
  0x57   : > { %v206_v3 = vsel %vm204_vm0, %v202_v1, 0.0  ;;  %v311_v25 = vunpack.c.l.s4 %v642_v24  ;;  %s335_s30 = sshll.u32 %s199_s27, 4  ;;  %s828_s8 = scalar_lea.hbm %s875_s3, %s435_s22  ;;  %s830_s30 = int_to_ptr.vmem [resolvable:$true] %s335_s30 }
  0x58   : > { %v207_v4 = vadd.f32 %v206_v3, %v205_v2  ;;  %v218_v10 = vsub.s32 %v215_v8, %v217_v9  ;;  %v304_v21 = vsub.s32 0, %v217_v9  ;;  %s321_s9 = scalar_lea.sflag [#allocation4], %s805_s29  ;;  %s566_s10 = scalar_lea.vmem %s830_s30, 128 }
  0x59   : > { %v312_v26 = vunpack.c.0.s8 %v311_v25  ;;  %p567_p6 = scmp.ne.s32.totalorder %s830_s30, %s566_s10  ;;  %s643_s16 = smov [#allocation7]  }
  0x5a   : > { %208 = vadd.xlane.f32.xlu0 %v207_v4  ;;  %s570_s21 = sshll.u32 %s643_s16, 4  ;;  %s571_s21 = int_to_ptr.vmem [resolvable:$false] %s570_s21 }
  0x5b   : > { %v315_v27 = vsub.s32 %v312_v26, %v217_v9  ;;  %p568_p9 = pnand %p567_p6, %p756_p8  ;;  %s572_s24 = scalar_lea.vmem %s571_s21, 256 }
  0x5c   : > { %p573_p13 = scmp.lt.s32.totalorder %s830_s30, %s571_s21  ;;  %p574_p0 = scmp.lt.s32.totalorder %s572_s24, %s566_s10 }
  0x5d   : > { %p569_p12 = pneg %p568_p9 }
  0x5e   : > { %p575_p5 = por %p574_p0, %p573_p13 }
  0x60   : > { %p576_p10 = pnand %p575_p5, %p569_p12 }
  0xe7   : > { %v209_v11 = vpop.xlane.xlu0 %208 }
  0xe8   : > { %v210_v12 = vmul.f32 0.00390625, %v209_v11 }
  0xea   : > { %v219_v13 = vrot.slane %v210_v12, %v218_v10 }
  0xec   : > { %441 = vmatmul.mubr.msk.f32.vlgmr.msra.gmra.mrb[0].mxu0 %vm220_vm2, %v219_v13 }
 0x1bf   : > { %v292_v15 = vpop.f32.mrb[0].mxu0 }
 0x1c0   : > { %v293_v16 = vadd.f32 %v292_v15, %v212_v14  ;;  %v442_v17 = vpop.f32.mrb[1].mxu0 }
 0x1c2   : > { %v428_v18 = vmul.f32 -1.442695, %v293_v16 }
 0x1c4   : > { %504 = vpow2.f32 %v428_v18 }
 0x1ce   : > { %v505_v19 = vpop.eup %504 }
 0x1cf   : > { %v299_v20 = vadd.f32 1.0, %v505_v19 }
 0x1d1   : > { %506 = vrcp.f32 %v299_v20 }
 0x1db   : > { %v507_v22 = vpop.eup %506 }
 0x1dc   : > { %v305_v23 = vrot.slane %v507_v22, %v304_v21 }
 0x1de   : > { %307 = vbcast.lane.b32.xlu0 %v305_v23, 256 }
 0x250   : > { %v308_v28 = vpop.permute.xlu0 %307 }
 0x251   : > { %v316_v29 = vrot.slane %v308_v28, %v315_v27 }
 0x253   : > { %v318_v30 = vmul.f32 %v316_v29, %v200_v0 }
 0x255   : > { %319 = vst [vmem:[%s199_s27] sm:$0xff] %v318_v30 }
 0x256   : > { %579 = shalt.err (!%p576_p10)
}
 0x257   : > { %s580_s25 = scalar_lea.hbm %s828_s8, 128  ;;  %s584_s26 = scalar_lea.hbm %s875_s3, 256 }
 0x258   : > { %p581_p1 = scmp.ne.s32.totalorder %s828_s8, %s580_s25  ;;  %p585_p3 = scmp.lt.u32.totalorder %s828_s8, %s875_s3 }
 0x259   : > { %p586_p11 = scmp.lt.u32.totalorder %s584_s26, %s580_s25  ;;  %p588_p6 = scmp.lt.u32.totalorder %s580_s25, %s828_s8 }
 0x25a   : > { %p582_p2 = pnand %p581_p1, %p756_p8 }
 0x25b   : > { %p587_p4 = por %p586_p11, %p585_p3 }
 0x25c   : > { %p583_p7 = pneg %p582_p2 }
 0x25d   : > { %p589_p9 = por %p588_p6, %p587_p4 }
 0x25f   : > { %p590_p12 = pnand %p589_p9, %p583_p7 }
 0x261   : > { %593 = shalt.err (!%p590_p12)
}
 0x262   : > { %449 = dma.vmem_to_hbm [thread:$0]  (%p756_p8), %s830_s30, 128, %s828_s8, %s321_s9  }
 0x263 PF: > { %s347_s18 = sand.u32 1, %s624_s12   ;;  %p894_p13 = scmp.ne.s32.totalorder %s880_s19, 0 }
 0x264   : > { %p895_p0 = scmp.ge.s32.totalorder %s636_s15, 2  ;;  %s348_s20 = scalar_lea.sflag [#allocation4], %s347_s18 }
 0x266   : > { %p460_p5 = pnand %p895_p0, %p894_p13 }
 0x268   : > { %619 = dma.done.wait (!%p460_p5), %s348_s20, 128  }
 0x269   : > { %621 = vsyncadd (!%p460_p5), %s348_s20, 4294967168  ;;  %p17_p10 = scmp.ge.s32.totalorder %s712_s23, 4   ;;  %s896_s12 = smov %s628_s13 }
 0x26a   : > { %s897_s13 = smov %s632_s14  ;;  %s898_s14 = smov %s748_s11 }
 0x26b   : > { %s899_s15 = smov %s712_s23  ;;  %19 = sbr.rel (!%p17_p10) target bundleno = 6 (0x6), region = 81 }
 0x272   :  { %353 = vsyncpa [#allocation3], 1 }
 0x273   :  { %355 = vsyncpa [#allocation3 + $0x1], 1 }
 0x274   :  { %356 = vsyncpa [#allocation6], 1 }
 0x275   :  { %357 = vsyncpa [#allocation4], 1 }
 0x276   :  { %359 = vsyncpa [#allocation4 + $0x1], 1 }

</bundles_post_ra>
